<compile_context>
chip_gen: v7x
topology: tpu7x:2x2x1
jax: 0.10.0
libtpu: 0.0.40
codegen_flags: <defaults>
</compile_context>

<pallas_src>
import functools
from typing import NamedTuple

import jax
import jax.numpy as jnp
from jax.experimental import pallas as pl
from jax.experimental.pallas import tpu as pltpu

LN_EPS = 1e-5      # PyTorch nn.LayerNorm default eps
LANE = 128         # TPU vreg lane width
SUBLANE = 8        # TPU vreg sublane count (f32)
SPLIT_THRESHOLD = 256   # below this padded batch, a single grid step is cheapest


def _round_up(x, m):
    return ((x + m - 1) // m) * m


class ActorGeom(NamedTuple):
    state_dim: int
    h1: int
    h2: int
    action_dim: int
    h1p: int
    h2p: int
    vw: int


def prepare_params(params):
    """One-time padding/packing of the target-network parameters.

    Re-run only when the parameters change (i.e. after a soft update), so the
    per-step hot path contains no pad/concat XLA ops.
    """
    S, H1 = params["w1"].shape
    H2 = params["w2"].shape[1]
    A = params["w3"].shape[1]
    H1p = _round_up(H1, LANE)
    H2p = _round_up(H2, LANE)
    Vw = max(H1p, H2p, _round_up(A, LANE))

    def pad2(a, rows, cols):
        a = jnp.asarray(a, jnp.float32)
        return jnp.pad(a, ((0, rows - a.shape[0]), (0, cols - a.shape[1])))

    def row(v, width):
        v = jnp.asarray(v, jnp.float32).reshape(1, -1)
        return jnp.pad(v, ((0, 0), (0, width - v.shape[1])))

    prepared = {
        # State contraction dim left unpadded (S); hidden dims padded to 128.
        "w1": pad2(params["w1"], S, H1p),
        "w2": pad2(params["w2"], H1p, H2p),
        # True action width kept unpadded in the output head.
        "w3": pad2(params["w3"], H2p, A),
        # Seven small per-layer vectors packed into one [8, Vw] slab (one DMA).
        # Padded gamma/beta lanes are zero -> padded activations stay zero.
        "vecs": jnp.concatenate(
            [row(params["b1"], Vw), row(params["g1"], Vw), row(params["be1"], Vw),
             row(params["b2"], Vw), row(params["g2"], Vw), row(params["be2"], Vw),
             row(params["b3"], Vw),
             jnp.zeros((1, Vw), jnp.float32)],      # pad to 8 sublanes
            axis=0),
    }
    geom = ActorGeom(state_dim=S, h1=H1, h2=H2, action_dim=A,
                     h1p=H1p, h2p=H2p, vw=Vw)
    return prepared, geom


def _make_actor_kernel(geom: ActorGeom):
    """Build the fused MLP kernel with static (padded) widths baked in."""
    H1, H2 = geom.h1, geom.h2
    H1p, H2p, A = geom.h1p, geom.h2p, geom.action_dim

    def layernorm(h, gamma, beta, true_dim):
        # Padded lanes of h are exactly zero, so whole-row sums equal the
        # true-width sums; gamma/beta padding is zero, so padded output lanes
        # stay exactly zero for the next (zero-padded) matmul.
        inv_d = jnp.float32(1.0 / true_dim)
        mu = jnp.sum(h, axis=-1, keepdims=True) * inv_d
        ex2 = jnp.sum(h * h, axis=-1, keepdims=True) * inv_d
        var = jnp.maximum(ex2 - mu * mu, 0.0)
        return (h - mu) * jax.lax.rsqrt(var + LN_EPS) * gamma + beta

    def actor_kernel(x_ref, w1_ref, w2_ref, w3_ref, vec_ref, o_ref):
        x = x_ref[...]                       # (TM, S)  -- S unpadded
        vec = vec_ref[...]                   # (8, Vw)  packed bias/LN vectors
        b1, g1, be1 = vec[0:1, :H1p], vec[1:2, :H1p], vec[2:3, :H1p]
        b2, g2, be2 = vec[3:4, :H2p], vec[4:5, :H2p], vec[5:6, :H2p]
        b3 = vec[6:7, :A]

        # Layer 1: Linear -> ReLU -> LayerNorm (stats over true width H1)
        h = jnp.dot(x, w1_ref[...], preferred_element_type=jnp.float32) + b1
        h = jnp.maximum(h, 0.0)
        h = layernorm(h, g1, be1, H1)

        # Layer 2: Linear -> ReLU -> LayerNorm (stats over true width H2)
        h = jnp.dot(h, w2_ref[...], preferred_element_type=jnp.float32) + b2
        h = jnp.maximum(h, 0.0)
        h = layernorm(h, g2, be2, H2)

        # Output head: Linear -> Tanh, emitted at the true action width A
        out = jnp.dot(h, w3_ref[...], preferred_element_type=jnp.float32) + b3
        o_ref[...] = jnp.tanh(out)

    return actor_kernel


@functools.partial(jax.jit, static_argnames=("geom", "block_rows"))
def target_actor_forward(state, prepared, *, geom: ActorGeom, block_rows=1024):
    """state: [B, state_dim] f32; prepared/geom: output of prepare_params."""
    B = state.shape[0]
    S, A = geom.state_dim, geom.action_dim
    H1p, H2p, Vw = geom.h1p, geom.h2p, geom.vw

    # Batch tiling: large tiles to amortize per-step overhead; at large batch
    # cap the tile at ceil(B/2) so the "parallel" axis can use both v7x TCs.
    Bp8 = _round_up(B, SUBLANE)
    if Bp8 <= SPLIT_THRESHOLD:
        TM = Bp8
    else:
        TM = min(_round_up(block_rows, SUBLANE),
                 _round_up(pl.cdiv(Bp8, 2), SUBLANE))
    Bp = _round_up(Bp8, TM)
    num_blocks = Bp // TM

    x = state if Bp == B else jnp.pad(state, ((0, Bp - B), (0, 0)))

    kernel = _make_actor_kernel(geom)

    cost = pl.CostEstimate(
        flops=2 * Bp * (S * H1p + H1p * H2p + H2p * A),
        transcendentals=Bp * (A + 2),            # tanh on A lanes + 2 rsqrt/row
        bytes_accessed=4 * (Bp * S + Bp * A                   # activations in/out
                            + S * H1p + H1p * H2p + H2p * A   # weights, once
                            + 8 * Vw),                        # packed vectors
    )

    out = pl.pallas_call(
        kernel,
        out_shape=jax.ShapeDtypeStruct((Bp, A), jnp.float32),
        grid=(num_blocks,),
        in_specs=[
            pl.BlockSpec((TM, S), lambda i: (i, 0)),     # state, unpadded lanes
            pl.BlockSpec((S, H1p), lambda i: (0, 0)),    # weights: VMEM-resident
            pl.BlockSpec((H1p, H2p), lambda i: (0, 0)),
            pl.BlockSpec((H2p, A), lambda i: (0, 0)),
            pl.BlockSpec((8, Vw), lambda i: (0, 0)),     # packed bias/LN vectors
        ],
        out_specs=pl.BlockSpec((TM, A), lambda i: (i, 0)),   # true-width output
        compiler_params=pltpu.CompilerParams(
            dimension_semantics=("parallel",),           # batch blocks independent
        ),
        cost_estimate=cost,
    )(x, prepared["w1"], prepared["w2"], prepared["w3"], prepared["vecs"])

    return out if Bp == B else out[:B]


def init_params(key, state_dim, action_dim, hidden_dims):
    """Deterministic synthetic parameter init (target == online deep copy)."""
    dims = [state_dim] + list(hidden_dims) + [action_dim]
    keys = jax.random.split(key, 2 * (len(dims) - 1))
    params = {}
    for i in range(len(dims) - 1):
        fan_in, fan_out = dims[i], dims[i + 1]
        scale = 1.0 / jnp.sqrt(jnp.float32(fan_in))
        w = jax.random.uniform(keys[2 * i], (fan_in, fan_out),
                               jnp.float32, -scale, scale)
        b = jax.random.uniform(keys[2 * i + 1], (1, fan_out),
                               jnp.float32, -scale, scale)
        params[f"w{i + 1}"] = w
        params[f"b{i + 1}"] = b
        if i < len(hidden_dims):
            # LayerNorm affine params (PyTorch init: gamma=1, beta=0)
            params[f"g{i + 1}"] = jnp.ones((1, fan_out), jnp.float32)
            params[f"be{i + 1}"] = jnp.zeros((1, fan_out), jnp.float32)
    return params


def _reference_layernorm(h, gamma, beta):
    mu = jnp.mean(h, axis=-1, keepdims=True)
    var = jnp.mean((h - mu) * (h - mu), axis=-1, keepdims=True)
    return (h - mu) * jax.lax.rsqrt(var + LN_EPS) * gamma + beta


def reference_forward(state, params):
    h = jnp.maximum(state @ params["w1"] + params["b1"], 0.0)
    h = _reference_layernorm(h, params["g1"], params["be1"])
    h = jnp.maximum(h @ params["w2"] + params["b2"], 0.0)
    h = _reference_layernorm(h, params["g2"], params["be2"])
    return jnp.tanh(h @ params["w3"] + params["b3"])


if __name__ == "__main__":
    # Small shapes consistent with the module's forward (state -> MLP -> action).
    B, STATE_DIM, ACTION_DIM = 8, 16, 4
    HIDDEN_DIMS = [32, 32]

    key = jax.random.PRNGKey(0)
    k_state, k_params = jax.random.split(key)
    state = jax.random.normal(k_state, (B, STATE_DIM), jnp.float32)
    params = init_params(k_params, STATE_DIM, ACTION_DIM, HIDDEN_DIMS)

    # One-time parameter prep (re-run only after a soft_update); not in the
    # per-step hot path.
    prepared, geom = prepare_params(params)
    prepared = jax.block_until_ready(prepared)

    out = target_actor_forward(state, prepared, geom=geom)
    out = jax.block_until_ready(out)

    ref = reference_forward(state, params)
    assert out.shape == (B, ACTION_DIM)
    assert jnp.allclose(out, ref, atol=1e-5, rtol=1e-5), "mismatch vs JAX reference"

    print("KERNEL_OK")
</pallas_src>

<mosaic_0001>
module attributes {stable_mosaic.version = 11 : i64} {
  func.func @actor_kernel(%arg0: i32, %arg1: memref<8x16xf32, #tpu.memory_space<vmem>>, %arg2: memref<16x128xf32, #tpu.memory_space<vmem>>, %arg3: memref<128x128xf32, #tpu.memory_space<vmem>>, %arg4: memref<128x4xf32, #tpu.memory_space<vmem>>, %arg5: memref<8x128xf32, #tpu.memory_space<vmem>>, %arg6: memref<8x4xf32, #tpu.memory_space<vmem>>) attributes {dimension_semantics = [#tpu.dimension_semantics<parallel>], iteration_bounds = array<i64: 1>, scalar_prefetch = 0 : i64, scratch_operands = 0 : i64, tpu.core_type = #tpu.core_type<tc>, window_params = [{transform_indices = @transform_0, window_bounds = array<i64: 8, 16>}, {pipeline_mode = #tpu.pipeline_mode<synchronous>, transform_indices = @transform_1, window_bounds = array<i64: 16, 128>}, {pipeline_mode = #tpu.pipeline_mode<synchronous>, transform_indices = @transform_2, window_bounds = array<i64: 128, 128>}, {pipeline_mode = #tpu.pipeline_mode<synchronous>, transform_indices = @transform_3, window_bounds = array<i64: 128, 4>}, {pipeline_mode = #tpu.pipeline_mode<synchronous>, transform_indices = @transform_4, window_bounds = array<i64: 8, 128>}, {transform_indices = @transform_5, window_bounds = array<i64: 8, 4>}]} {
    %c0 = arith.constant 0 : index
    %c0_0 = arith.constant 0 : index
    %0 = vector.load %arg1[%c0, %c0_0] : memref<8x16xf32, #tpu.memory_space<vmem>>, vector<8x16xf32>
    %c0_1 = arith.constant 0 : index
    %c0_2 = arith.constant 0 : index
    %1 = vector.load %arg5[%c0_1, %c0_2] : memref<8x128xf32, #tpu.memory_space<vmem>>, vector<8x128xf32>
    %2 = vector.extract_strided_slice %1 {offsets = [0, 0], sizes = [1, 128], strides = [1, 1]} : vector<8x128xf32> to vector<1x128xf32>
    %3 = vector.extract_strided_slice %1 {offsets = [1, 0], sizes = [1, 128], strides = [1, 1]} : vector<8x128xf32> to vector<1x128xf32>
    %4 = vector.extract_strided_slice %1 {offsets = [2, 0], sizes = [1, 128], strides = [1, 1]} : vector<8x128xf32> to vector<1x128xf32>
    %5 = vector.extract_strided_slice %1 {offsets = [3, 0], sizes = [1, 128], strides = [1, 1]} : vector<8x128xf32> to vector<1x128xf32>
    %6 = vector.extract_strided_slice %1 {offsets = [4, 0], sizes = [1, 128], strides = [1, 1]} : vector<8x128xf32> to vector<1x128xf32>
    %7 = vector.extract_strided_slice %1 {offsets = [5, 0], sizes = [1, 128], strides = [1, 1]} : vector<8x128xf32> to vector<1x128xf32>
    %8 = vector.extract_strided_slice %1 {offsets = [6, 0], sizes = [1, 4], strides = [1, 1]} : vector<8x128xf32> to vector<1x4xf32>
    %c0_3 = arith.constant 0 : index
    %c0_4 = arith.constant 0 : index
    %9 = vector.load %arg2[%c0_3, %c0_4] : memref<16x128xf32, #tpu.memory_space<vmem>>, vector<16x128xf32>
    %cst = arith.constant dense<0.000000e+00> : vector<8x128xf32>
    %10 = tpu.matmul %0, %9, %cst {dimension_numbers = #tpu.dot_dimension_numbers<[1], [0], [0], [1], [0, 0, 1, 1], [], []>} : vector<8x16xf32>, vector<16x128xf32>, vector<8x128xf32> -> vector<8x128xf32>
    %11 = vector.broadcast %2 : vector<1x128xf32> to vector<8x128xf32>
    %12 = arith.addf %10, %11 : vector<8x128xf32>
    %cst_5 = arith.constant 0.000000e+00 : f32
    %13 = vector.broadcast %cst_5 : f32 to vector<8x128xf32>
    %14 = arith.maximumf %12, %13 : vector<8x128xf32>
    %cst_6 = arith.constant dense<0.000000e+00> : vector<8xf32>
    %15 = vector.multi_reduction <add>, %14, %cst_6 [1] : vector<8x128xf32> to vector<8xf32>
    %16 = vector.shape_cast %15 : vector<8xf32> to vector<8x1xf32>
    %cst_7 = arith.constant 3.125000e-02 : f32
    %17 = vector.broadcast %cst_7 : f32 to vector<8x1xf32>
    %18 = arith.mulf %16, %17 : vector<8x1xf32>
    %19 = arith.mulf %14, %14 : vector<8x128xf32>
    %cst_8 = arith.constant dense<0.000000e+00> : vector<8xf32>
    %20 = vector.multi_reduction <add>, %19, %cst_8 [1] : vector<8x128xf32> to vector<8xf32>
    %21 = vector.shape_cast %20 : vector<8xf32> to vector<8x1xf32>
    %cst_9 = arith.constant 3.125000e-02 : f32
    %22 = vector.broadcast %cst_9 : f32 to vector<8x1xf32>
    %23 = arith.mulf %21, %22 : vector<8x1xf32>
    %24 = arith.mulf %18, %18 : vector<8x1xf32>
    %25 = arith.subf %23, %24 : vector<8x1xf32>
    %cst_10 = arith.constant 0.000000e+00 : f32
    %26 = vector.broadcast %cst_10 : f32 to vector<8x1xf32>
    %27 = arith.maximumf %25, %26 : vector<8x1xf32>
    %28 = vector.broadcast %18 : vector<8x1xf32> to vector<8x128xf32>
    %29 = arith.subf %14, %28 : vector<8x128xf32>
    %cst_11 = arith.constant 9.99999974E-6 : f32
    %30 = vector.broadcast %cst_11 : f32 to vector<8x1xf32>
    %31 = arith.addf %27, %30 : vector<8x1xf32>
    %32 = math.rsqrt %31 : vector<8x1xf32>
    %33 = vector.broadcast %32 : vector<8x1xf32> to vector<8x128xf32>
    %34 = arith.mulf %29, %33 : vector<8x128xf32>
    %35 = vector.broadcast %3 : vector<1x128xf32> to vector<8x128xf32>
    %36 = arith.mulf %34, %35 : vector<8x128xf32>
    %37 = vector.broadcast %4 : vector<1x128xf32> to vector<8x128xf32>
    %38 = arith.addf %36, %37 : vector<8x128xf32>
    %c0_12 = arith.constant 0 : index
    %c0_13 = arith.constant 0 : index
    %39 = vector.load %arg3[%c0_12, %c0_13] : memref<128x128xf32, #tpu.memory_space<vmem>>, vector<128x128xf32>
    %cst_14 = arith.constant dense<0.000000e+00> : vector<8x128xf32>
    %40 = tpu.matmul %38, %39, %cst_14 {dimension_numbers = #tpu.dot_dimension_numbers<[1], [0], [0], [1], [0, 0, 1, 1], [], []>} : vector<8x128xf32>, vector<128x128xf32>, vector<8x128xf32> -> vector<8x128xf32>
    %41 = vector.broadcast %5 : vector<1x128xf32> to vector<8x128xf32>
    %42 = arith.addf %40, %41 : vector<8x128xf32>
    %cst_15 = arith.constant 0.000000e+00 : f32
    %43 = vector.broadcast %cst_15 : f32 to vector<8x128xf32>
    %44 = arith.maximumf %42, %43 : vector<8x128xf32>
    %cst_16 = arith.constant dense<0.000000e+00> : vector<8xf32>
    %45 = vector.multi_reduction <add>, %44, %cst_16 [1] : vector<8x128xf32> to vector<8xf32>
    %46 = vector.shape_cast %45 : vector<8xf32> to vector<8x1xf32>
    %cst_17 = arith.constant 3.125000e-02 : f32
    %47 = vector.broadcast %cst_17 : f32 to vector<8x1xf32>
    %48 = arith.mulf %46, %47 : vector<8x1xf32>
    %49 = arith.mulf %44, %44 : vector<8x128xf32>
    %cst_18 = arith.constant dense<0.000000e+00> : vector<8xf32>
    %50 = vector.multi_reduction <add>, %49, %cst_18 [1] : vector<8x128xf32> to vector<8xf32>
    %51 = vector.shape_cast %50 : vector<8xf32> to vector<8x1xf32>
    %cst_19 = arith.constant 3.125000e-02 : f32
    %52 = vector.broadcast %cst_19 : f32 to vector<8x1xf32>
    %53 = arith.mulf %51, %52 : vector<8x1xf32>
    %54 = arith.mulf %48, %48 : vector<8x1xf32>
    %55 = arith.subf %53, %54 : vector<8x1xf32>
    %cst_20 = arith.constant 0.000000e+00 : f32
    %56 = vector.broadcast %cst_20 : f32 to vector<8x1xf32>
    %57 = arith.maximumf %55, %56 : vector<8x1xf32>
    %58 = vector.broadcast %48 : vector<8x1xf32> to vector<8x128xf32>
    %59 = arith.subf %44, %58 : vector<8x128xf32>
    %cst_21 = arith.constant 9.99999974E-6 : f32
    %60 = vector.broadcast %cst_21 : f32 to vector<8x1xf32>
    %61 = arith.addf %57, %60 : vector<8x1xf32>
    %62 = math.rsqrt %61 : vector<8x1xf32>
    %63 = vector.broadcast %62 : vector<8x1xf32> to vector<8x128xf32>
    %64 = arith.mulf %59, %63 : vector<8x128xf32>
    %65 = vector.broadcast %6 : vector<1x128xf32> to vector<8x128xf32>
    %66 = arith.mulf %64, %65 : vector<8x128xf32>
    %67 = vector.broadcast %7 : vector<1x128xf32> to vector<8x128xf32>
    %68 = arith.addf %66, %67 : vector<8x128xf32>
    %c0_22 = arith.constant 0 : index
    %c0_23 = arith.constant 0 : index
    %69 = vector.load %arg4[%c0_22, %c0_23] : memref<128x4xf32, #tpu.memory_space<vmem>>, vector<128x4xf32>
    %cst_24 = arith.constant dense<0.000000e+00> : vector<8x4xf32>
    %70 = tpu.matmul %68, %69, %cst_24 {dimension_numbers = #tpu.dot_dimension_numbers<[1], [0], [0], [1], [0, 0, 1, 1], [], []>} : vector<8x128xf32>, vector<128x4xf32>, vector<8x4xf32> -> vector<8x4xf32>
    %71 = vector.broadcast %8 : vector<1x4xf32> to vector<8x4xf32>
    %72 = arith.addf %70, %71 : vector<8x4xf32>
    %73 = math.tanh %72 : vector<8x4xf32>
    %c0_25 = arith.constant 0 : index
    %c0_26 = arith.constant 0 : index
    %74 = vector.load %arg6[%c0_25, %c0_26] : memref<8x4xf32, #tpu.memory_space<vmem>>, vector<8x4xf32>
    tpu.vector_store %arg6[%c0_25, %c0_26], %73 {strides = array<i32>} : memref<8x4xf32, #tpu.memory_space<vmem>>, vector<8x4xf32>,
    return
  }
  func.func @transform_0(%arg0: i32) -> (i32, i32) {
    %c0_i32 = arith.constant 0 : i32
    %c0_i32_0 = arith.constant 0 : i32
    return %arg0, %c0_i32 : i32, i32
  }
  func.func @transform_1(%arg0: i32) -> (i32, i32) {
    %c0_i32 = arith.constant 0 : i32
    %c0_i32_0 = arith.constant 0 : i32
    %c0_i32_1 = arith.constant 0 : i32
    return %c0_i32, %c0_i32_0 : i32, i32
  }
  func.func @transform_2(%arg0: i32) -> (i32, i32) {
    %c0_i32 = arith.constant 0 : i32
    %c0_i32_0 = arith.constant 0 : i32
    %c0_i32_1 = arith.constant 0 : i32
    return %c0_i32, %c0_i32_0 : i32, i32
  }
  func.func @transform_3(%arg0: i32) -> (i32, i32) {
    %c0_i32 = arith.constant 0 : i32
    %c0_i32_0 = arith.constant 0 : i32
    %c0_i32_1 = arith.constant 0 : i32
    return %c0_i32, %c0_i32_0 : i32, i32
  }
  func.func @transform_4(%arg0: i32) -> (i32, i32) {
    %c0_i32 = arith.constant 0 : i32
    %c0_i32_0 = arith.constant 0 : i32
    %c0_i32_1 = arith.constant 0 : i32
    return %c0_i32, %c0_i32_0 : i32, i32
  }
  func.func @transform_5(%arg0: i32) -> (i32, i32) {
    %c0_i32 = arith.constant 0 : i32
    %c0_i32_0 = arith.constant 0 : i32
    return %arg0, %c0_i32 : i32, i32
  }
}

</mosaic_0001>

<bundles_post_ra>
// kernel: target_actor_forward.1
= control target key start
LH: loop header
LB: loop body
LE: loop exit
PB: predicated region body
PF: predicated region fallthrough
CT: control target
= control target key end

     0   :  { %10 = vsyncpa [#allocation3], 0  ;;  %s792_s0 = inlined_call_operand.vmem [shape: f32[8,16], index: 0, kind: input, shape index: {}]   ;;  %s793_s1 = inlined_call_operand.hbm [shape: f32[16,128], index: 1, kind: input, shape index: {}]   ;;  %s794_s2 = inlined_call_operand.vmem [shape: f32[128,128], index: 2, kind: input, shape index: {}]   ;;  %s795_s3 = inlined_call_operand.vmem [shape: f32[128,4], index: 3, kind: input, shape index: {}]   ;;  %s796_s4 = inlined_call_operand.hbm [shape: f32[8,128], index: 4, kind: input, shape index: {}]   ;;  %s797_s5 = inlined_call_operand.vmem [shape: f32[8,4], index: 5, kind: output, shape index: {}]  }
   0x1   :  { %11 = vsyncpa [#allocation5], 0  ;;  %s594_s18 = smov [#allocation2]   ;;  %s546_s22 = scalar_lea.hbm %s793_s1, 256 }
   0x2   :  { %s19_s19 = sshll.u32 %s594_s18, 4  ;;  %p547_p0 = scmp.ne.s32.totalorder %s793_s1, %s546_s22  ;;  %s20_s19 = int_to_ptr.vmem [resolvable:$true] %s19_s19 }
   0x3   :  { %p550_p1 = scmp.lt.u32.totalorder %s546_s22, %s793_s1 }
   0x5   :  { %p552_p2 = pnand %p550_p1, %p547_p0 }
   0x7   :  { %555 = shalt.err (!%p552_p2)
}
   0x8   :  { %s556_s27 = scalar_lea.vmem %s20_s19, 256  ;;  %p561_p4 = scmp.lt.s32.totalorder %s20_s19, %s20_s19 }
   0x9   :  { %p557_p3 = scmp.ne.s32.totalorder %s20_s19, %s556_s27  ;;  %p562_p5 = scmp.lt.s32.totalorder %s556_s27, %s556_s27 }
   0xb   :  { %p563_p6 = por %p562_p5, %p561_p4 }
   0xd   :  { %p564_p7 = pnand %p563_p6, %p557_p3 }
   0xf   :  { %567 = shalt.err (!%p564_p7)
}
  0x10   :  { %s595_s28 = smov 128   ;;  %s596_s29 = smov 8  }
  0x11   :  { %25 = dma.hbm_to_vmem [thread:$0]  %s793_s1, 256, %s20_s19, [#allocation3], %s595_s28, %s595_s28, %s596_s29  }
  0x12   :  { %s597_s7 = smov [#allocation4]   ;;  %s568_s11 = scalar_lea.hbm %s796_s4, 128 }
  0x13   :  { %s36_s8 = sshll.u32 %s597_s7, 4  ;;  %p569_p8 = scmp.ne.s32.totalorder %s796_s4, %s568_s11  ;;  %s37_s8 = int_to_ptr.vmem [resolvable:$true] %s36_s8 }
  0x14   :  { %p572_p9 = scmp.lt.u32.totalorder %s568_s11, %s796_s4 }
  0x16   :  { %p574_p10 = pnand %p572_p9, %p569_p8 }
  0x18   :  { %577 = shalt.err (!%p574_p10)
}
  0x19   :  { %s578_s16 = scalar_lea.vmem %s37_s8, 128  ;;  %p583_p12 = scmp.lt.s32.totalorder %s37_s8, %s37_s8 }
  0x1a   :  { %p579_p11 = scmp.ne.s32.totalorder %s37_s8, %s578_s16  ;;  %p584_p13 = scmp.lt.s32.totalorder %s578_s16, %s578_s16 }
  0x1c   :  { %p585_p0 = por %p584_p13, %p583_p12 }
  0x1e   :  { %p586_p1 = pnand %p585_p0, %p579_p11 }
  0x20   :  { %589 = shalt.err (!%p586_p1)
}
  0x21   :  { %39 = dma.hbm_to_vmem [thread:$0]  %s796_s4, 128, %s37_s8, [#allocation5]  }
  0x22   :  { %590 = dma.done.wait [#allocation3], 256  }
  0x23   :  { %591 = vsyncadd [#allocation3], 4294967040 }
  0x24   :  { %592 = dma.done.wait [#allocation5], 128  }
  0x25   :  { %593 = vsyncadd [#allocation5], 4294967168  ;;  %v598_v0 = vmov 0.0|0.0   ;;  %vm599_vm0 = vmmov 0   ;;  %v600_v1 = vmov 0.0   ;;  %v48_v2 = vld [vmem:[#allocation2] sm:$0xff]  ;;  %v50_v9 = vlaneseq }
  0x26   :  { %482 = vmatprep.subr.bf16.mxu0 %v598_v0  ;;  %409 = vmatprep.mubr.msk.f32.mxu0 %vm599_vm0, %v600_v1  ;;  %v49_v3 = vld [vmem:[#allocation2 + $0x8] sm:$0xff]  ;;  %v46_v5 = vld [vmem:[%s792_s0] sm:$0xff]  ;;  %vm54_vm1 = vcmask 130048   ;;  %v671_v12 = vld [vmem:[#allocation4] sm:$0xff]  ;;  %vm359_vm2 = vcmask 31744  }
  0x27   :  { %485 = vmatprep.subr.bf16.mxu1 %v598_v0  ;;  %444 = vmatprep.mubr.msk.f32.mxu1 %vm599_vm0, %v600_v1  ;;  %v483_v4 = vpack.c.bf16 %v49_v3, %v48_v2  ;;  %v153_v6 = vld [vmem:[%s794_s2] sm:$0xff]  ;;  %v154_v7 = vld [vmem:[%s794_s2 + $0x8] sm:$0xff]  ;;  %v668_v10 = vshrl.u32 %v50_v9, 7  ;;  %v155_v19 = vld [vmem:[%s794_s2 + $0x10] sm:$0xff] }
  0x28   :  { %v486_v8 = vpack.c.bf16 %v154_v7, %v153_v6  ;;  %v156_v20 = vld [vmem:[%s794_s2 + $0x18] sm:$0xff]  ;;  %v157_v22 = vld [vmem:[%s794_s2 + $0x20] sm:$0xff]  ;;  %v158_v23 = vld [vmem:[%s794_s2 + $0x28] sm:$0xff] }
  0x29   :  { %484 = vmatpush3.bf16.msra.mxu0 %v483_v4  ;;  %v52_v11 = vsub.s32 0, %v668_v10  ;;  %v489_v21 = vpack.c.bf16 %v156_v20, %v155_v19  ;;  %v492_v24 = vpack.c.bf16 %v158_v23, %v157_v22  ;;  %v159_v25 = vld [vmem:[%s794_s2 + $0x30] sm:$0xff]  ;;  %v160_v26 = vld [vmem:[%s794_s2 + $0x38] sm:$0xff]  ;;  %v161_v28 = vld [vmem:[%s794_s2 + $0x40] sm:$0xff]  ;;  %v145_v48 = vsub.s32 1, %v668_v10 }
  0x2a   :  { %509 = vmatprep.subr.bf16.mxu0 %v598_v0  ;;  %487 = vmatpush3.bf16.msra.mxu1 %v486_v8  ;;  %v495_v27 = vpack.c.bf16 %v160_v26, %v159_v25  ;;  %v162_v29 = vld [vmem:[%s794_s2 + $0x48] sm:$0xff]  ;;  %v163_v31 = vld [vmem:[%s794_s2 + $0x50] sm:$0xff]  ;;  %v164_v32 = vld [vmem:[%s794_s2 + $0x58] sm:$0xff]  ;;  %v150_v49 = vsub.s32 2, %v668_v10  ;;  %v171_v60 = vsub.s32 3, %v668_v10 }
  0x2b   :  { %488 = vmatprep.subr.bf16.mxu1 %v598_v0  ;;  %v53_v13 = vrot.slane %v671_v12, %v52_v11  ;;  %v498_v30 = vpack.c.bf16 %v162_v29, %v161_v28  ;;  %v501_v33 = vpack.c.bf16 %v164_v32, %v163_v31  ;;  %v165_v34 = vld [vmem:[%s794_s2 + $0x60] sm:$0xff]  ;;  %v166_v35 = vld [vmem:[%s794_s2 + $0x68] sm:$0xff]  ;;  %v167_v37 = vld [vmem:[%s794_s2 + $0x70] sm:$0xff]  ;;  %v146_v51 = vrot.slane %v671_v12, %v145_v48 }
  0x2c   :  { %410 = vmatmul.mubr.msk.f32.vlgmr.msra.gmra.mrb[0].mxu0 %vm54_vm1, %v46_v5  ;;  %v504_v36 = vpack.c.bf16 %v166_v35, %v165_v34  ;;  %v168_v38 = vld [vmem:[%s794_s2 + $0x78] sm:$0xff]  ;;  %v151_v54 = vrot.slane %v671_v12, %v150_v49  ;;  %v268_v57 = vld [vmem:[%s795_s3] sm:$0xff]  ;;  %v269_v58 = vld [vmem:[%s795_s3 + $0x8] sm:$0xff]  ;;  %v172_v61 = vrot.slane %v671_v12, %v171_v60  ;;  %v260_v35 = vsub.s32 4, %v668_v10 }
  0x2d   :  { %479 = vmatprep.mubr.msk.f32.mxu0 %vm599_vm0, %v600_v1  ;;  %v507_v39 = vpack.c.bf16 %v168_v38, %v167_v37  ;;  %v510_v59 = vpack.c.bf16 %v269_v58, %v268_v57  ;;  %v270_v4 = vld [vmem:[%s795_s3 + $0x10] sm:$0xff]  ;;  %v271_v5 = vld [vmem:[%s795_s3 + $0x18] sm:$0xff]  ;;  %v272_v7 = vld [vmem:[%s795_s3 + $0x20] sm:$0xff] }
  0x2e   :  { %490 = vmatpush3.bf16.msra.mxu1 %v489_v21  ;;  %v513_v6 = vpack.c.bf16 %v271_v5, %v270_v4  ;;  %v273_v8 = vld [vmem:[%s795_s3 + $0x28] sm:$0xff]  ;;  %v274_v11 = vld [vmem:[%s795_s3 + $0x30] sm:$0xff]  ;;  %v279_v19 = vld [vmem:[%s795_s3 + $0x58] sm:$0xff]  ;;  %v261_v38 = vrot.slane %v671_v12, %v260_v35 }
  0x2f   :  { %491 = vmatprep.subr.bf16.mxu1 %v598_v0  ;;  %511 = vmatpush3.bf16.msra.mxu0 %v510_v59  ;;  %v516_v9 = vpack.c.bf16 %v273_v8, %v272_v7  ;;  %v280_v21 = vld [vmem:[%s795_s3 + $0x60] sm:$0xff]  ;;  %v281_v22 = vld [vmem:[%s795_s3 + $0x68] sm:$0xff]  ;;  %v283_v25 = vld [vmem:[%s795_s3 + $0x78] sm:$0xff] }
  0x30   :  { %512 = vmatprep.subr.bf16.mxu0 %v598_v0  ;;  %v528_v23 = vpack.c.bf16 %v281_v22, %v280_v21 }
  0x32   :  { %493 = vmatpush3.bf16.msra.mxu1 %v492_v24  ;;  %v282_v24 = vld [vmem:[%s795_s3 + $0x70] sm:$0xff] }
  0x33   :  { %494 = vmatprep.subr.bf16.mxu1 %v598_v0  ;;  %514 = vmatpush3.bf16.msra.mxu0 %v513_v6  ;;  %v531_v26 = vpack.c.bf16 %v283_v25, %v282_v24 }
  0x34   :  { %515 = vmatprep.subr.bf16.mxu0 %v598_v0 }
  0x36   :  { %496 = vmatpush3.bf16.msra.mxu1 %v495_v27 }
  0x37   :  { %497 = vmatprep.subr.bf16.mxu1 %v598_v0  ;;  %517 = vmatpush3.bf16.msra.mxu0 %v516_v9 }
  0x38   :  { %518 = vmatprep.subr.bf16.mxu0 %v598_v0 }
  0x3a   :  { %499 = vmatpush3.bf16.msra.mxu1 %v498_v30 }
  0x3b   :  { %500 = vmatprep.subr.bf16.mxu1 %v598_v0 }
  0x3e   :  { %502 = vmatpush3.bf16.msra.mxu1 %v501_v33 }
  0x3f   :  { %503 = vmatprep.subr.bf16.mxu1 %v598_v0 }
  0x42   :  { %505 = vmatpush3.bf16.msra.mxu1 %v504_v36  ;;  %v265_v36 = vsub.s32 5, %v668_v10 }
  0x43   :  { %506 = vmatprep.subr.bf16.mxu1 %v598_v0 }
  0x46   :  { %508 = vmatpush3.bf16.msra.mxu1 %v507_v39 }
  0xff   :  { %v124_v14 = vpop.f32.mrb[0].mxu0 }
 0x100   :  { %v125_v15 = vadd.f32 %v124_v14, %v53_v13  ;;  %v411_v16 = vpop.f32.mrb[1].mxu0  ;;  %v275_v13 = vld [vmem:[%s795_s3 + $0x38] sm:$0xff] }
 0x101   :  { %v519_v14 = vpack.c.bf16 %v275_v13, %v274_v11  ;;  %v277_v16 = vld [vmem:[%s795_s3 + $0x48] sm:$0xff] }
 0x102   :  { %v128_v17 = vmax.f32 %v125_v15, 0.0  ;;  %v276_v15 = vld [vmem:[%s795_s3 + $0x40] sm:$0xff] }
 0x103   :  { %520 = vmatpush3.bf16.msra.mxu0 %v519_v14 }
 0x104   :  { %129 = vadd.xlane.f32.xlu0 %v128_v17  ;;  %v132_v18 = vmul.f32 %v128_v17, %v128_v17  ;;  %521 = vmatprep.subr.bf16.mxu0 %v598_v0 }
 0x108   :  { %133 = vadd.xlane.f32.xlu0 %v132_v18  ;;  %v278_v18 = vld [vmem:[%s795_s3 + $0x50] sm:$0xff] }
 0x109   :  { %v525_v20 = vpack.c.bf16 %v279_v19, %v278_v18 }
 0x191   :  { %v130_v40 = vpop.xlane.xlu0 %129 }
 0x192   :  { %v131_v41 = vmul.f32 0.03125, %v130_v40 }
 0x194   :  { %v136_v43 = vmul.f32 %v131_v41, %v131_v41  ;;  %v139_v50 = vsub.f32 %v128_v17, %v131_v41  ;;  %v522_v17 = vpack.c.bf16 %v277_v16, %v276_v15 }
 0x195   :  { %v134_v42 = vpop.xlane.xlu0 %133 }
 0x196   :  { %v135_v44 = vmul.f32 0.03125, %v134_v42  ;;  %523 = vmatpush3.bf16.msra.mxu0 %v522_v17 }
 0x197   :  { %524 = vmatprep.subr.bf16.mxu0 %v598_v0 }
 0x198   :  { %v137_v45 = vsub.f32 %v135_v44, %v136_v43  ;;  %v286_v43 = vsub.s32 6, %v668_v10 }
 0x19a   :  { %v138_v46 = vmax.f32 %v137_v45, 0.0  ;;  %526 = vmatpush3.bf16.msra.mxu0 %v525_v20  ;;  %v287_v44 = vrot.slane %v671_v12, %v286_v43 }
 0x19b   :  { %527 = vmatprep.subr.bf16.mxu0 %v598_v0 }
 0x19c   :  { %v140_v47 = vadd.f32 1e-05, %v138_v46 }
 0x19e   :  { %540 = vrsqrt.f32 %v140_v47  ;;  %529 = vmatpush3.bf16.msra.mxu0 %v528_v23 }
 0x19f   :  { %530 = vmatprep.subr.bf16.mxu0 %v598_v0  ;;  %v266_v0 = vrot.slane %v671_v12, %v265_v36 }
 0x1a2   :  { %532 = vmatpush3.bf16.msra.mxu0 %v531_v26 }
 0x1a8   :  { %v541_v52 = vpop.eup %540 }
 0x1a9   :  { %v142_v53 = vmul.f32 %v541_v52, %v139_v50 }
 0x1ab   :  { %v147_v55 = vmul.f32 %v146_v51, %v142_v53 }
 0x1ad   :  { %v152_v56 = vadd.f32 %v151_v54, %v147_v55 }
 0x1af   :  { %445 = vmatmul.mubr.f32.vlgmr.msra.gmra.mrb[0].mxu1 %v152_v56 }
 0x282   :  { %v239_v62 = vpop.f32.mrb[0].mxu1 }
 0x283   :  { %v240_v63 = vadd.f32 %v239_v62, %v172_v61  ;;  %v446_v1 = vpop.f32.mrb[1].mxu1 }
 0x285   :  { %v243_v2 = vmax.f32 %v240_v63, 0.0 }
 0x287   :  { %244 = vadd.xlane.f32.xlu1 %v243_v2  ;;  %v247_v3 = vmul.f32 %v243_v2, %v243_v2 }
 0x28b   :  { %248 = vadd.xlane.f32.xlu1 %v247_v3 }
 0x314   :  { %v245_v27 = vpop.xlane.xlu1 %244 }
 0x315   :  { %v246_v28 = vmul.f32 0.03125, %v245_v27 }
 0x317   :  { %v251_v30 = vmul.f32 %v246_v28, %v246_v28  ;;  %v254_v37 = vsub.f32 %v243_v2, %v246_v28 }
 0x318   :  { %v249_v29 = vpop.xlane.xlu1 %248 }
 0x319   :  { %v250_v31 = vmul.f32 0.03125, %v249_v29 }
 0x31b   :  { %v252_v32 = vsub.f32 %v250_v31, %v251_v30 }
 0x31d   :  { %v253_v33 = vmax.f32 %v252_v32, 0.0 }
 0x31f   :  { %v255_v34 = vadd.f32 1e-05, %v253_v33 }
 0x321   :  { %542 = vrsqrt.f32 %v255_v34 }
 0x32b   :  { %v543_v39 = vpop.eup %542 }
 0x32c   :  { %v257_v40 = vmul.f32 %v543_v39, %v254_v37 }
 0x32e   :  { %v262_v41 = vmul.f32 %v261_v38, %v257_v40 }
 0x330   :  { %v267_v42 = vadd.f32 %v266_v0, %v262_v41 }
 0x332   :  { %480 = vmatmul.mubr.f32.vlgmr.msra.gmra.mrb[2].mxu0 %v267_v42 }
 0x405   :  { %v354_v45 = vpop.f32.mrb[2].mxu0 }
 0x406   :  { %v355_v46 = vadd.f32 %v354_v45, %v287_v44  ;;  %v481_v47 = vpop.f32.mrb[3].mxu0 }
 0x408   :  { %544 = vtanh.f32 %v355_v46 }
 0x412   :  { %v545_v48 = vpop.eup %544 }
 0x413   :  { %360 = vst.msk [vmem:[%s797_s5] sm:$0xff] %vm359_vm2, %v545_v48 }
 0x414   :  { %365 = vsyncpa [#allocation3], 1 }
 0x415   :  { %366 = vsyncpa [#allocation5], 1 }

</bundles_post_ra>
